<compile_context>
chip_gen: v7x
topology: tpu7x:2x2x1
jax: 0.10.0
libtpu: 0.0.40
codegen_flags: <defaults>
</compile_context>

<pallas_src>
import functools

import jax
import jax.numpy as jnp
from jax.experimental import pallas as pl
from jax.experimental.pallas import tpu as pltpu


def _round_up(n: int, m: int) -> int:
    return ((n + m - 1) // m) * m


def critic_kernel(x_ref, w1_ref, b1_ref, w2_ref, b2_ref, w3_ref, b3_ref, o_ref,
                  *, use_bf16_matmul: bool):
    """One batch tile of the 3-layer MLP.

    x_ref : (TB, obs_dim)  streamed per grid step
    w*/b* : resident weights/biases (constant index maps)
    b3_ref: (1, 1) scalar in SMEM
    o_ref : (TB, 1)
    """
    x = x_ref[...]  # f32 (TB, obs_dim)

    if use_bf16_matmul:
        # Matmul operands in bf16 (2x MXU throughput on v6e/v7x), f32 accumulation.
        # Bias add + tanh stay in f32 (v5e VPU/EUP have no bf16 path).
        a1, k1 = x.astype(jnp.bfloat16), w1_ref[...].astype(jnp.bfloat16)
    else:
        a1, k1 = x, w1_ref[...]

    h1 = jnp.dot(a1, k1, preferred_element_type=jnp.float32) + b1_ref[...]
    h1 = jnp.tanh(h1)  # (TB, 64), f32 on EUP

    if use_bf16_matmul:
        a2, k2 = h1.astype(jnp.bfloat16), w2_ref[...].astype(jnp.bfloat16)
    else:
        a2, k2 = h1, w2_ref[...]

    h2 = jnp.dot(a2, k2, preferred_element_type=jnp.float32) + b2_ref[...]
    h2 = jnp.tanh(h2)  # (TB, 32), f32

    # Final layer has N=1: a (TB,32)@(32,1) matmul would use 1/128..1/256 of the MXU
    # lanes and add an MXU drain. Do it on the VPU + a cross-lane (XLU) reduce
    # instead, which lives in different VLIW slots than the two real matmuls.
    h3 = jnp.sum(h2 * w3_ref[...], axis=-1, keepdims=True) + b3_ref[0, 0]  # (TB, 1)

    o_ref[...] = h3.astype(o_ref.dtype)


def critic_forward(x, params, *, tb: int = 512, use_bf16_matmul: bool = False):
    """x: (B, obs_dim) float32 -> (B, 1) float32."""
    w1, b1, w2, b2, w3, b3 = params
    B, obs_dim = x.shape

    # Batch tile: multiple of 8 (sublane), capped so tiny batches don't over-pad.
    tb = max(8, min(int(tb), _round_up(B, 8)))
    g = pl.cdiv(B, tb)
    b_pad = g * tb
    if b_pad != B:
        x = jnp.pad(x, ((0, b_pad - B), (0, 0)))

    kernel = functools.partial(critic_kernel, use_bf16_matmul=use_bf16_matmul)

    out = pl.pallas_call(
        kernel,
        out_shape=jax.ShapeDtypeStruct((b_pad, 1), jnp.float32),
        grid=(g,),
        in_specs=[
            # x tile streams across the batch grid (pipelined DMA).
            pl.BlockSpec((tb, obs_dim), lambda i: (i, 0)),
            # Weights/biases: constant index maps -> fetched once, VMEM-resident.
            pl.BlockSpec(w1.shape, lambda i: (0, 0)),
            pl.BlockSpec(b1.shape, lambda i: (0, 0)),
            pl.BlockSpec(w2.shape, lambda i: (0, 0)),
            pl.BlockSpec(b2.shape, lambda i: (0, 0)),
            pl.BlockSpec(w3.shape, lambda i: (0, 0)),
            # b3 is a scalar: keep it in SMEM, no padded (8,128) VMEM tile / DMA.
            pl.BlockSpec(memory_space=pltpu.MemorySpace.SMEM),
        ],
        # (TB, 1) output tile. Lane-width-1 stores are acceptable here because the
        # output stream is obs_dim x smaller than the x stream.
        # TODO(synk): for very large B, switch to a lane-dense (1, TB) output slab.
        out_specs=pl.BlockSpec((tb, 1), lambda i: (i, 0)),
        compiler_params=pltpu.CompilerParams(
            # Batch tiles are independent -> shard across v7x's two TensorCores.
            dimension_semantics=("parallel",),
        ),
    )(x, w1, b1, w2, b2, w3, b3)

    return out[:B]


def init_params(key, obs_dim):
    """Deterministic init mirroring nn.Linear (w1/w2 stored as (in, out), w3 as (1, 32))."""
    k1, k2, k3, k4, k5, k6 = jax.random.split(key, 6)

    def uniform(k, shape, fan_in):
        bound = 1.0 / jnp.sqrt(fan_in)
        return jax.random.uniform(k, shape, jnp.float32, -bound, bound)

    w1 = uniform(k1, (obs_dim, 64), obs_dim)
    b1 = uniform(k2, (1, 64), obs_dim)
    w2 = uniform(k3, (64, 32), 64)
    b2 = uniform(k4, (1, 32), 64)
    w3 = uniform(k5, (1, 32), 32)   # PyTorch fc3.weight layout (out, in)
    b3 = uniform(k6, (1, 1), 32)
    return (w1, b1, w2, b2, w3, b3)


if __name__ == "__main__":
    key = jax.random.PRNGKey(0)
    k_x, k_p = jax.random.split(key)

    # Small but non-trivial: exercises multi-step grid (tb=128 -> 3 tiles) + padding.
    B, obs_dim = 300, 24
    x = jax.random.normal(k_x, (B, obs_dim), jnp.float32)
    params = init_params(k_p, obs_dim)

    # Pure-JAX reference.
    w1, b1, w2, b2, w3, b3 = params
    ref = jnp.tanh(x @ w1 + b1)
    ref = jnp.tanh(ref @ w2 + b2)
    ref = ref @ w3.T + b3

    # f32 path (exact semantics of the PyTorch module).
    out = critic_forward(x, params, tb=128)
    jax.block_until_ready(out)
    assert out.shape == (B, 1)
    assert jnp.allclose(out, ref, atol=1e-5, rtol=1e-5), "f32 mismatch vs reference"

    # bf16-matmul path (v6e/v7x throughput option), f32 accumulation + f32 tanh.
    out_bf16 = critic_forward(x, params, tb=128, use_bf16_matmul=True)
    jax.block_until_ready(out_bf16)
    assert out_bf16.shape == (B, 1)
    assert jnp.allclose(out_bf16, ref, atol=5e-2, rtol=5e-2), "bf16 mismatch vs reference"

    print("KERNEL_OK")
</pallas_src>

<mosaic_0001>
module attributes {stable_mosaic.version = 11 : i64} {
  func.func @critic_kernel(%arg0: i32, %arg1: memref<128x24xf32, #tpu.memory_space<vmem>>, %arg2: memref<24x64xf32, #tpu.memory_space<vmem>>, %arg3: memref<1x64xf32, #tpu.memory_space<vmem>>, %arg4: memref<64x32xf32, #tpu.memory_space<vmem>>, %arg5: memref<1x32xf32, #tpu.memory_space<vmem>>, %arg6: memref<1x32xf32, #tpu.memory_space<vmem>>, %arg7: memref<1x1xf32, #tpu.memory_space<smem>>, %arg8: memref<128x1xf32, #tpu.memory_space<vmem>>) attributes {dimension_semantics = [#tpu.dimension_semantics<parallel>], iteration_bounds = array<i64: 3>, scalar_prefetch = 0 : i64, scratch_operands = 0 : i64, tpu.core_type = #tpu.core_type<tc>, window_params = [{transform_indices = @transform_0, window_bounds = array<i64: 128, 24>}, {pipeline_mode = #tpu.pipeline_mode<synchronous>, transform_indices = @transform_1, window_bounds = array<i64: 24, 64>}, {pipeline_mode = #tpu.pipeline_mode<synchronous>, transform_indices = @transform_2, window_bounds = array<i64: 1, 64>}, {pipeline_mode = #tpu.pipeline_mode<synchronous>, transform_indices = @transform_3, window_bounds = array<i64: 64, 32>}, {pipeline_mode = #tpu.pipeline_mode<synchronous>, transform_indices = @transform_4, window_bounds = array<i64: 1, 32>}, {pipeline_mode = #tpu.pipeline_mode<synchronous>, transform_indices = @transform_5, window_bounds = array<i64: 1, 32>}, {transform_indices = @transform_6, window_bounds = array<i64: 1, 1>}, {transform_indices = @transform_7, window_bounds = array<i64: 128, 1>}]} {
    %c0 = arith.constant 0 : index
    %c0_0 = arith.constant 0 : index
    %0 = vector.load %arg1[%c0, %c0_0] : memref<128x24xf32, #tpu.memory_space<vmem>>, vector<128x24xf32>
    %c0_1 = arith.constant 0 : index
    %c0_2 = arith.constant 0 : index
    %1 = vector.load %arg2[%c0_1, %c0_2] : memref<24x64xf32, #tpu.memory_space<vmem>>, vector<24x64xf32>
    %cst = arith.constant dense<0.000000e+00> : vector<128x64xf32>
    %2 = tpu.matmul %0, %1, %cst {dimension_numbers = #tpu.dot_dimension_numbers<[1], [0], [0], [1], [0, 0, 1, 1], [], []>} : vector<128x24xf32>, vector<24x64xf32>, vector<128x64xf32> -> vector<128x64xf32>
    %c0_3 = arith.constant 0 : index
    %c0_4 = arith.constant 0 : index
    %3 = vector.load %arg3[%c0_3, %c0_4] : memref<1x64xf32, #tpu.memory_space<vmem>>, vector<1x64xf32>
    %4 = vector.broadcast %3 : vector<1x64xf32> to vector<128x64xf32>
    %5 = arith.addf %2, %4 : vector<128x64xf32>
    %6 = math.tanh %5 : vector<128x64xf32>
    %c0_5 = arith.constant 0 : index
    %c0_6 = arith.constant 0 : index
    %7 = vector.load %arg4[%c0_5, %c0_6] : memref<64x32xf32, #tpu.memory_space<vmem>>, vector<64x32xf32>
    %cst_7 = arith.constant dense<0.000000e+00> : vector<128x32xf32>
    %8 = tpu.matmul %6, %7, %cst_7 {dimension_numbers = #tpu.dot_dimension_numbers<[1], [0], [0], [1], [0, 0, 1, 1], [], []>} : vector<128x64xf32>, vector<64x32xf32>, vector<128x32xf32> -> vector<128x32xf32>
    %c0_8 = arith.constant 0 : index
    %c0_9 = arith.constant 0 : index
    %9 = vector.load %arg5[%c0_8, %c0_9] : memref<1x32xf32, #tpu.memory_space<vmem>>, vector<1x32xf32>
    %10 = vector.broadcast %9 : vector<1x32xf32> to vector<128x32xf32>
    %11 = arith.addf %8, %10 : vector<128x32xf32>
    %12 = math.tanh %11 : vector<128x32xf32>
    %c0_10 = arith.constant 0 : index
    %c0_11 = arith.constant 0 : index
    %13 = vector.load %arg6[%c0_10, %c0_11] : memref<1x32xf32, #tpu.memory_space<vmem>>, vector<1x32xf32>
    %14 = vector.broadcast %13 : vector<1x32xf32> to vector<128x32xf32>
    %15 = arith.mulf %12, %14 : vector<128x32xf32>
    %cst_12 = arith.constant dense<0.000000e+00> : vector<128xf32>
    %16 = vector.multi_reduction <add>, %15, %cst_12 [1] : vector<128x32xf32> to vector<128xf32>
    %17 = vector.shape_cast %16 : vector<128xf32> to vector<128x1xf32>
    %c0_13 = arith.constant 0 : index
    %c0_14 = arith.constant 0 : index
    %18 = memref.load %arg7[%c0_13, %c0_14] : memref<1x1xf32, #tpu.memory_space<smem>>
    %19 = vector.broadcast %18 : f32 to vector<128x1xf32>
    %20 = arith.addf %17, %19 : vector<128x1xf32>
    %c0_15 = arith.constant 0 : index
    %c0_16 = arith.constant 0 : index
    %21 = vector.load %arg8[%c0_15, %c0_16] : memref<128x1xf32, #tpu.memory_space<vmem>>, vector<128x1xf32>
    tpu.vector_store %arg8[%c0_15, %c0_16], %20 {strides = array<i32>} : memref<128x1xf32, #tpu.memory_space<vmem>>, vector<128x1xf32>,
    return
  }
  func.func @transform_0(%arg0: i32) -> (i32, i32) {
    %c0_i32 = arith.constant 0 : i32
    %c0_i32_0 = arith.constant 0 : i32
    return %arg0, %c0_i32 : i32, i32
  }
  func.func @transform_1(%arg0: i32) -> (i32, i32) {
    %c0_i32 = arith.constant 0 : i32
    %c0_i32_0 = arith.constant 0 : i32
    %c0_i32_1 = arith.constant 0 : i32
    return %c0_i32, %c0_i32_0 : i32, i32
  }
  func.func @transform_2(%arg0: i32) -> (i32, i32) {
    %c0_i32 = arith.constant 0 : i32
    %c0_i32_0 = arith.constant 0 : i32
    %c0_i32_1 = arith.constant 0 : i32
    return %c0_i32, %c0_i32_0 : i32, i32
  }
  func.func @transform_3(%arg0: i32) -> (i32, i32) {
    %c0_i32 = arith.constant 0 : i32
    %c0_i32_0 = arith.constant 0 : i32
    %c0_i32_1 = arith.constant 0 : i32
    return %c0_i32, %c0_i32_0 : i32, i32
  }
  func.func @transform_4(%arg0: i32) -> (i32, i32) {
    %c0_i32 = arith.constant 0 : i32
    %c0_i32_0 = arith.constant 0 : i32
    %c0_i32_1 = arith.constant 0 : i32
    return %c0_i32, %c0_i32_0 : i32, i32
  }
  func.func @transform_5(%arg0: i32) -> (i32, i32) {
    %c0_i32 = arith.constant 0 : i32
    %c0_i32_0 = arith.constant 0 : i32
    %c0_i32_1 = arith.constant 0 : i32
    return %c0_i32, %c0_i32_0 : i32, i32
  }
  func.func @transform_6(%arg0: i32) -> (i32, i32) {
    %c0_i32 = arith.constant 0 : i32
    %c0_i32_0 = arith.constant 0 : i32
    %c0_i32_1 = arith.constant 0 : i32
    return %c0_i32, %c0_i32_0 : i32, i32
  }
  func.func @transform_7(%arg0: i32) -> (i32, i32) {
    %c0_i32 = arith.constant 0 : i32
    %c0_i32_0 = arith.constant 0 : i32
    return %arg0, %c0_i32 : i32, i32
  }
}

</mosaic_0001>

<bundles_post_ra>
// kernel: tpu_custom_call.1
= control target key start
LH: loop header
LB: loop body
LE: loop exit
PB: predicated region body
PF: predicated region fallthrough
CT: control target
= control target key end

     0   :  { %s1217_s26 = smov 0   ;;  %s1437_s0 = inlined_call_operand.vmem [shape: f32[384,24], index: 0, kind: input, shape index: {}]   ;;  %s1438_s1 = inlined_call_operand.vmem [shape: f32[24,64], index: 1, kind: input, shape index: {}]   ;;  %s1439_s2 = inlined_call_operand.vmem [shape: f32[1,64], index: 2, kind: input, shape index: {}]   ;;  %s1440_s3 = inlined_call_operand.vmem [shape: f32[64,32], index: 3, kind: input, shape index: {}]   ;;  %s1441_s4 = inlined_call_operand.vmem [shape: f32[1,32], index: 4, kind: input, shape index: {}]   ;;  %s1442_s5 = inlined_call_operand.vmem [shape: f32[1,32], index: 5, kind: input, shape index: {}]   ;;  %s1443_s6 = inlined_call_operand.<no memory space> [shape: f32[1,1], index: 6, kind: input, shape index: {}]   ;;  %s1444_s7 = inlined_call_operand.vmem [shape: f32[384,1], index: 7, kind: output, shape index: {}]  }
   0x1   :  { %12 = sst [smem:[#allocation2]] %s1443_s6 }
   0x2 LB: > { %s907_s27 = sadd.s32 4294967295, %s1172_s26   ;;  %p911_p0 = scmp.ge.s32.totalorder %s1172_s26, 1  ;;  %s1172_s26 = sphi %s1217_s26, %s18_s26  }
   0x3   : > { %p239_p1 = scmp.lt.s32.totalorder %s1172_s26, 4 }
   0x5   : > { %p240_p2 = pnand %p911_p0, %p239_p1 }
   0x6   : > { %v299_v0 = vld [vmem:[%s1438_s1] sm:$0xff] (!%p240_p2)  ;;  %v300_v1 = vld [vmem:[%s1438_s1 + $0x8] sm:$0xff] (!%p240_p2)  ;;  %s912_s8 = sshll.u32 (!%p240_p2), %s907_s27, 4  ;;  %v521_v5 = vld [vmem:[%s1440_s3 + $0x10] sm:$0xff] (!%p240_p2)  ;;  %vm309_vm0 = vcmask (!%p240_p2), 195584   ;;  %vm534_vm1 = vcmask (!%p240_p2), 523264  }
   0x7   : > { %243 = sbr.rel (%p240_p2) target bundleno = 651 (0x28b), region = 48  ;;  %v1066_v2 = vpack.c.bf16 (!%p240_p2), %v300_v1, %v299_v0  ;;  %p272_p3 = scmp.lt.s32.totalorder (!%p240_p2), %s912_s8, 47  ;;  %v519_v3 = vld [vmem:[%s1440_s3] sm:$0xff] (!%p240_p2)  ;;  %v520_v4 = vld [vmem:[%s1440_s3 + $0x8] sm:$0xff] (!%p240_p2)  ;;  %v301_v6 = vld [vmem:[%s1438_s1 + $0x10] sm:$0xff] (!%p240_p2)  ;;  %vm767_vm2 = vcmask (!%p240_p2), 261120  }
   0x8   : > { %v1070_v7 = vpack.c.bf16 (!%p240_p2), %v520_v4, %v519_v3  ;;  %v522_v8 = vld [vmem:[%s1440_s3 + $0x18] sm:$0xff] (!%p240_p2)  ;;  %v523_v26 = vld [vmem:[%s1440_s3 + $0x20] sm:$0xff] (!%p240_p2)  ;;  %v524_v27 = vld [vmem:[%s1440_s3 + $0x28] sm:$0xff] (!%p240_p2)  ;;  %s816_s15 = sld [smem:[#allocation2]] (!%p240_p2)  ;;  %vm834_vm3 = vcmask (!%p240_p2), 7168  }
   0x9   : > { %1067 = vmatprep.subr.bf16.mxu0 (!%p240_p2), %v1066_v2  ;;  %v1074_v9 = vpack.c.bf16 (!%p240_p2), %v522_v8, %v521_v5  ;;  %v1078_v28 = vpack.c.bf16 (!%p240_p2), %v524_v27, %v523_v26  ;;  %v525_v29 = vld [vmem:[%s1440_s3 + $0x30] sm:$0xff] (!%p240_p2)  ;;  %v526_v30 = vld [vmem:[%s1440_s3 + $0x38] sm:$0xff] (!%p240_p2)  ;;  %v1303_v32 = vld [vmem:[%s1439_s2] ss:$0 sm:$0xff] (!%p240_p2) }
   0xa   : > { %1069 = vmatpush3.bf16.msra.mxu0 (!%p240_p2), %v1066_v2  ;;  %1086 = vmatprep.subr.bf16.mxu1 (!%p240_p2), %v1070_v7  ;;  %v1082_v31 = vpack.c.bf16 (!%p240_p2), %v526_v30, %v525_v29  ;;  %v1351_v30 = vld [vmem:[%s1442_s5] ss:$0 sm:$0xff] (!%p240_p2) }
   0xb   : > { %1000 = vmatprep.subr.mxu0 (!%p240_p2), %v301_v6  ;;  %1090 = vmatpush3.bf16.msra.mxu1 (!%p240_p2), %v1070_v7 }
   0xc   : > { %1087 = vmatprep.subr.bf16.mxu1 (!%p240_p2), %v1074_v9 }
   0xe   : > { %s1446_s8 = smov (!%p272_p3, %s912_s8), 47  ;;  %1001 = vmatpush3.msra.mxu0 %v301_v6 }
   0xf   : > { %s913_s19 = sshll.u32 %s1446_s8, 3  ;;  %1071 = vmatprep.subr.bf16.mxu0 %v1070_v7  ;;  %1091 = vmatpush3.bf16.msra.mxu1 %v1074_v9 }
  0x10   : > { %s1254_s22 = scalar_lea.vmem %s1437_s0, %s913_s19  ;;  %1088 = vmatprep.subr.bf16.mxu1 %v1078_v28  ;;  %s1400_s18 = scalar_lea.vmem %s1444_s7, %s913_s19 }
  0x11   : > { %v283_v10 = vld [vmem:[%s1254_s22] sm:$0xff]  ;;  %v284_v11 = vld [vmem:[%s1254_s22 + $0x8] sm:$0xff]  ;;  %v285_v12 = vld [vmem:[%s1254_s22 + $0x10] sm:$0xff] }
  0x12   : > { %1002 = vmatprep.mubr.msk.f32.mxu0 %vm309_vm0, %v283_v10  ;;  %v286_v13 = vld [vmem:[%s1254_s22 + $0x18] sm:$0xff]  ;;  %v287_v14 = vld [vmem:[%s1254_s22 + $0x20] sm:$0xff]  ;;  %v288_v15 = vld [vmem:[%s1254_s22 + $0x28] sm:$0xff] }
  0x13   : > { %1003 = vmatmul.mubr.msk.f32.vlgmr.msra.gmra.mrb[0].mxu0 %vm309_vm0, %v284_v11  ;;  %v289_v16 = vld [vmem:[%s1254_s22 + $0x30] sm:$0xff]  ;;  %v290_v17 = vld [vmem:[%s1254_s22 + $0x38] sm:$0xff]  ;;  %v291_v18 = vld [vmem:[%s1254_s22 + $0x40] sm:$0xff]  ;;  %1092 = vmatpush3.bf16.msra.mxu1 %v1078_v28 }
  0x14   : > { %1005 = vmatprep.mubr.msk.f32.mxu0 %vm309_vm0, %v285_v12  ;;  %1073 = vmatpush3.bf16.msra.mxu0 %v1070_v7  ;;  %v292_v19 = vld [vmem:[%s1254_s22 + $0x48] sm:$0xff]  ;;  %v293_v20 = vld [vmem:[%s1254_s22 + $0x50] sm:$0xff]  ;;  %v294_v21 = vld [vmem:[%s1254_s22 + $0x58] sm:$0xff] }
  0x15   : > { %1075 = vmatprep.subr.bf16.mxu0 %v1074_v9  ;;  %v295_v22 = vld [vmem:[%s1254_s22 + $0x60] sm:$0xff]  ;;  %v296_v23 = vld [vmem:[%s1254_s22 + $0x68] sm:$0xff]  ;;  %v297_v24 = vld [vmem:[%s1254_s22 + $0x70] sm:$0xff]  ;;  %1089 = vmatprep.subr.bf16.mxu1 %v1082_v31 }
  0x16   : > { %v298_v25 = vld [vmem:[%s1254_s22 + $0x78] sm:$0xff] }
  0x17   : > { %1006 = vmatmul.mubr.msk.f32.gmra.mrb[2].mxu0 %vm309_vm0, %v286_v13  ;;  %1093 = vmatpush3.bf16.msra.mxu1 %v1082_v31 }
  0x18   : > { %1008 = vmatprep.mubr.msk.f32.mxu0 %vm309_vm0, %v287_v14  ;;  %1077 = vmatpush3.bf16.msra.mxu0 %v1074_v9 }
  0x19   : > { %1079 = vmatprep.subr.bf16.mxu0 %v1078_v28 }
  0x1b   : > { %1009 = vmatmul.mubr.msk.f32.gmra.mrb[4].mxu0 %vm309_vm0, %v288_v15 }
  0x1c   : > { %1011 = vmatprep.mubr.msk.f32.mxu0 %vm309_vm0, %v289_v16  ;;  %1081 = vmatpush3.bf16.msra.mxu0 %v1078_v28 }
  0x1d   : > { %1083 = vmatprep.subr.bf16.mxu0 %v1082_v31 }
  0x1f   : > { %1012 = vmatmul.mubr.msk.f32.gmra.mrb[6].mxu0 %vm309_vm0, %v290_v17  ;;  %v1340_v17 = vld [vmem:[%s1441_s4] ss:$0 sm:$0xff] }
  0x20   : > { %1014 = vmatprep.mubr.msk.f32.mxu0 %vm309_vm0, %v291_v18  ;;  %1085 = vmatpush3.bf16.msra.mxu0 %v1082_v31 }
  0x23   : > { %1015 = vmatmul.mubr.msk.f32.gmra.mrb[8].mxu0 %vm309_vm0, %v292_v19 }
  0x24   : > { %1017 = vmatprep.mubr.msk.f32.mxu0 %vm309_vm0, %v293_v20 }
  0x27   : > { %1018 = vmatmul.mubr.msk.f32.gmra.mrb[10].mxu0 %vm309_vm0, %v294_v21 }
  0x28   : > { %1020 = vmatprep.mubr.msk.f32.mxu0 %vm309_vm0, %v295_v22 }
  0x2b   : > { %1021 = vmatmul.mubr.msk.f32.gmra.mrb[12].mxu0 %vm309_vm0, %v296_v23 }
  0x2c   : > { %1023 = vmatprep.mubr.msk.f32.mxu0 %vm309_vm0, %v297_v24 }
  0x2f   : > { %1024 = vmatmul.mubr.msk.f32.gmra.mrb[14].mxu0 %vm309_vm0, %v298_v25 }
  0xe6   : > { %v1004_v33 = vpop.f32.mrb[0].mxu0 }
  0xe7   : > { %v430_v34 = vadd.f32 %v1004_v33, %v1303_v32  ;;  %v424_v35 = vpop.f32.mrb[1].mxu0 }
  0xe8   : > { %v425_v36 = vadd.f32 %v1303_v32, %v424_v35 }
  0xea   : > { %1102 = vtanh.f32 %v425_v36  ;;  %v1007_v37 = vpop.f32.mrb[2].mxu0 }
  0xeb   : > { %1104 = vtanh.f32 %v430_v34  ;;  %v440_v38 = vadd.f32 %v1007_v37, %v1303_v32  ;;  %v434_v39 = vpop.f32.mrb[3].mxu0 }
  0xec   : > { %v435_v40 = vadd.f32 %v1303_v32, %v434_v39 }
  0xee   : > { %1106 = vtanh.f32 %v435_v40  ;;  %v1010_v41 = vpop.f32.mrb[4].mxu0 }
  0xef   : > { %1108 = vtanh.f32 %v440_v38  ;;  %v450_v42 = vadd.f32 %v1010_v41, %v1303_v32  ;;  %v444_v43 = vpop.f32.mrb[5].mxu0 }
  0xf0   : > { %v445_v44 = vadd.f32 %v1303_v32, %v444_v43 }
  0xf1   : > { %1110 = vtanh.f32 %v450_v42 }
  0xf2   : > { %1112 = vtanh.f32 %v445_v44  ;;  %v1013_v45 = vpop.f32.mrb[6].mxu0 }
  0xf3   : > { %v460_v46 = vadd.f32 %v1013_v45, %v1303_v32  ;;  %v454_v47 = vpop.f32.mrb[7].mxu0 }
  0xf4   : > { %v1103_v48 = vpop.eup %1102  ;;  %v455_v49 = vadd.f32 %v1303_v32, %v454_v47 }
  0xf5   : > { %v1105_v50 = vpop.eup %1104  ;;  %1114 = vtanh.f32 %v460_v46  ;;  %1042 = vmatprep.mubr.msk.f32.mxu0 %vm534_vm1, %v1103_v48 }
  0xf6   : > { %1116 = vtanh.f32 %v455_v49  ;;  %v1016_v51 = vpop.f32.mrb[8].mxu0  ;;  %1043 = vmatmul.mubr.msk.f32.vlgmr.msra.gmra.mrb[16].mxu0 %vm534_vm1, %v1105_v50 }
  0xf7   : > { %v470_v52 = vadd.f32 %v1016_v51, %v1303_v32  ;;  %v464_v53 = vpop.f32.mrb[9].mxu0 }
  0xf8   : > { %v1107_v54 = vpop.eup %1106  ;;  %v465_v55 = vadd.f32 %v1303_v32, %v464_v53 }
  0xf9   : > { %v1109_v56 = vpop.eup %1108  ;;  %1118 = vtanh.f32 %v470_v52  ;;  %1045 = vmatprep.mubr.msk.f32.mxu1 %vm534_vm1, %v1107_v54 }
  0xfa   : > { %1120 = vtanh.f32 %v465_v55  ;;  %v1019_v57 = vpop.f32.mrb[10].mxu0  ;;  %1046 = vmatmul.mubr.msk.f32.vlgmr.msra.gmra.mrb[0].mxu1 %vm534_vm1, %v1109_v56 }
  0xfb   : > { %v1111_v58 = vpop.eup %1110  ;;  %v480_v59 = vadd.f32 %v1019_v57, %v1303_v32  ;;  %v474_v60 = vpop.f32.mrb[11].mxu0 }
  0xfc   : > { %v1113_v61 = vpop.eup %1112  ;;  %v475_v62 = vadd.f32 %v1303_v32, %v474_v60 }
  0xfd   : > { %1122 = vtanh.f32 %v480_v59  ;;  %1048 = vmatprep.mubr.msk.f32.mxu1 %vm534_vm1, %v1113_v61 }
  0xfe   : > { %1124 = vtanh.f32 %v475_v62  ;;  %v1022_v63 = vpop.f32.mrb[12].mxu0  ;;  %1049 = vmatmul.mubr.msk.f32.gmra.mrb[2].mxu1 %vm534_vm1, %v1111_v58 }
  0xff   : > { %v1115_v0 = vpop.eup %1114  ;;  %v490_v1 = vadd.f32 %v1022_v63, %v1303_v32  ;;  %v484_v2 = vpop.f32.mrb[13].mxu0 }
 0x100   : > { %v1117_v3 = vpop.eup %1116  ;;  %v485_v4 = vadd.f32 %v1303_v32, %v484_v2 }
 0x101   : > { %1126 = vtanh.f32 %v490_v1  ;;  %1051 = vmatprep.mubr.msk.f32.mxu1 %vm534_vm1, %v1117_v3 }
 0x102   : > { %1128 = vtanh.f32 %v485_v4  ;;  %v1025_v5 = vpop.f32.mrb[14].mxu0  ;;  %1052 = vmatmul.mubr.msk.f32.gmra.mrb[4].mxu1 %vm534_vm1, %v1115_v0 }
 0x103   : > { %v1119_v6 = vpop.eup %1118  ;;  %v500_v7 = vadd.f32 %v1025_v5, %v1303_v32  ;;  %v494_v8 = vpop.f32.mrb[15].mxu0 }
 0x104   : > { %v1121_v9 = vpop.eup %1120  ;;  %v495_v10 = vadd.f32 %v1303_v32, %v494_v8 }
 0x105   : > { %1130 = vtanh.f32 %v500_v7  ;;  %1054 = vmatprep.mubr.msk.f32.mxu1 %vm534_vm1, %v1121_v9 }
 0x106   : > { %1132 = vtanh.f32 %v495_v10  ;;  %1055 = vmatmul.mubr.msk.f32.gmra.mrb[6].mxu1 %vm534_vm1, %v1119_v6 }
 0x107   : > { %v1123_v11 = vpop.eup %1122 }
 0x108   : > { %v1125_v12 = vpop.eup %1124 }
 0x109   : > { %1057 = vmatprep.mubr.msk.f32.mxu1 %vm534_vm1, %v1125_v12 }
 0x10a   : > { %1058 = vmatmul.mubr.msk.f32.gmra.mrb[8].mxu1 %vm534_vm1, %v1123_v11 }
 0x10b   : > { %v1127_v13 = vpop.eup %1126 }
 0x10c   : > { %v1129_v14 = vpop.eup %1128 }
 0x10d   : > { %1060 = vmatprep.mubr.msk.f32.mxu1 %vm534_vm1, %v1129_v14 }
 0x10e   : > { %1061 = vmatmul.mubr.msk.f32.gmra.mrb[10].mxu1 %vm534_vm1, %v1127_v13 }
 0x10f   : > { %v1131_v15 = vpop.eup %1130 }
 0x110   : > { %v1133_v16 = vpop.eup %1132 }
 0x111   : > { %1063 = vmatprep.mubr.msk.f32.mxu1 %vm534_vm1, %v1133_v16 }
 0x112   : > { %1064 = vmatmul.mubr.msk.f32.gmra.mrb[12].mxu1 %vm534_vm1, %v1131_v15 }
 0x1c9   : > { %v1044_v18 = vpop.f32.mrb[16].mxu0 }
 0x1ca   : > { %v655_v19 = vadd.f32 %v1044_v18, %v1340_v17  ;;  %v649_v20 = vpop.f32.mrb[17].mxu0 }
 0x1cb   : > { %v650_v21 = vadd.f32 %v1340_v17, %v649_v20 }
 0x1cc   : > { %1134 = vtanh.f32 %v655_v19 }
 0x1cd   : > { %1136 = vtanh.f32 %v650_v21  ;;  %v1047_v22 = vpop.f32.mrb[0].mxu1 }
 0x1ce   : > { %v665_v23 = vadd.f32 %v1047_v22, %v1340_v17  ;;  %v659_v24 = vpop.f32.mrb[1].mxu1 }
 0x1cf   : > { %v660_v25 = vadd.f32 %v1340_v17, %v659_v24 }
 0x1d0   : > { %1138 = vtanh.f32 %v665_v23 }
 0x1d1   : > { %1140 = vtanh.f32 %v660_v25  ;;  %v1050_v26 = vpop.f32.mrb[2].mxu1 }
 0x1d2   : > { %v675_v27 = vadd.f32 %v1050_v26, %v1340_v17  ;;  %v669_v28 = vpop.f32.mrb[3].mxu1 }
 0x1d3   : > { %v670_v29 = vadd.f32 %v1340_v17, %v669_v28 }
 0x1d4   : > { %1142 = vtanh.f32 %v675_v27 }
 0x1d5   : > { %1144 = vtanh.f32 %v670_v29  ;;  %v1053_v31 = vpop.f32.mrb[4].mxu1 }
 0x1d6   : > { %v1135_v32 = vpop.eup %1134  ;;  %v685_v33 = vadd.f32 %v1053_v31, %v1340_v17  ;;  %v679_v34 = vpop.f32.mrb[5].mxu1 }
 0x1d7   : > { %v1137_v35 = vpop.eup %1136  ;;  %v680_v36 = vadd.f32 %v1340_v17, %v679_v34  ;;  %v752_v37 = vmul.f32 %v1135_v32, %v1351_v30 }
 0x1d8   : > { %1146 = vtanh.f32 %v685_v33  ;;  %v751_v40 = vmul.f32 %v1137_v35, %v1351_v30 }
 0x1d9   : > { %1148 = vtanh.f32 %v680_v36  ;;  %v1056_v38 = vpop.f32.mrb[6].mxu1  ;;  %v771_v39 = vsel %vm767_vm2, %v752_v37, 0.0  ;;  %v817_v36 = vstv %s816_s15 }
 0x1da   : > { %v1139_v41 = vpop.eup %1138  ;;  %v695_v42 = vadd.f32 %v1056_v38, %v1340_v17  ;;  %v689_v43 = vpop.f32.mrb[7].mxu1  ;;  %772 = vadd.xlane.f32.xlu0 %v771_v39  ;;  %v768_v49 = vsel %vm767_vm2, %v751_v40, 0.0 }
 0x1db   : > { %v1141_v44 = vpop.eup %1140  ;;  %v690_v45 = vadd.f32 %v1340_v17, %v689_v43  ;;  %v754_v46 = vmul.f32 %v1139_v41, %v1351_v30 }
 0x1dc   : > { %1150 = vtanh.f32 %v695_v42  ;;  %v753_v50 = vmul.f32 %v1141_v44, %v1351_v30 }
 0x1dd   : > { %1152 = vtanh.f32 %v690_v45  ;;  %v1059_v47 = vpop.f32.mrb[8].mxu1  ;;  %v777_v48 = vsel %vm767_vm2, %v754_v46, 0.0 }
 0x1de   : > { %v1143_v51 = vpop.eup %1142  ;;  %v705_v52 = vadd.f32 %v1059_v47, %v1340_v17  ;;  %778 = vadd.xlane.f32.xlu1 %v777_v48  ;;  %v699_v53 = vpop.f32.mrb[9].mxu1  ;;  %769 = vadd.xlane.f32.xlu0 %v768_v49  ;;  %v774_v58 = vsel %vm767_vm2, %v753_v50, 0.0 }
 0x1df   : > { %v1145_v54 = vpop.eup %1144  ;;  %v700_v55 = vadd.f32 %v1340_v17, %v699_v53  ;;  %v756_v59 = vmul.f32 %v1143_v51, %v1351_v30 }
 0x1e0   : > { %1154 = vtanh.f32 %v705_v52  ;;  %v755_v56 = vmul.f32 %v1145_v54, %v1351_v30 }
 0x1e1   : > { %1156 = vtanh.f32 %v700_v55  ;;  %v1062_v57 = vpop.f32.mrb[10].mxu1  ;;  %v783_v4 = vsel %vm767_vm2, %v756_v59, 0.0 }
 0x1e2   : > { %v1147_v60 = vpop.eup %1146  ;;  %v715_v61 = vadd.f32 %v1062_v57, %v1340_v17  ;;  %v709_v62 = vpop.f32.mrb[11].mxu1  ;;  %775 = vadd.xlane.f32.xlu1 %v774_v58  ;;  %v780_v63 = vsel %vm767_vm2, %v755_v56, 0.0 }
 0x1e3   : > { %v1149_v0 = vpop.eup %1148  ;;  %v710_v1 = vadd.f32 %v1340_v17, %v709_v62  ;;  %781 = vadd.xlane.f32.xlu0 %v780_v63  ;;  %v758_v5 = vmul.f32 %v1147_v60, %v1351_v30 }
 0x1e4   : > { %1158 = vtanh.f32 %v715_v61  ;;  %v757_v2 = vmul.f32 %v1149_v0, %v1351_v30 }
 0x1e5   : > { %1160 = vtanh.f32 %v710_v1  ;;  %v1065_v3 = vpop.f32.mrb[12].mxu1  ;;  %v789_v13 = vsel %vm767_vm2, %v758_v5, 0.0 }
 0x1e6   : > { %v1151_v6 = vpop.eup %1150  ;;  %v725_v7 = vadd.f32 %v1065_v3, %v1340_v17  ;;  %v719_v8 = vpop.f32.mrb[13].mxu1  ;;  %784 = vadd.xlane.f32.xlu1 %v783_v4  ;;  %v786_v9 = vsel %vm767_vm2, %v757_v2, 0.0 }
 0x1e7   : > { %v1153_v10 = vpop.eup %1152  ;;  %v720_v11 = vadd.f32 %v1340_v17, %v719_v8  ;;  %787 = vadd.xlane.f32.xlu0 %v786_v9  ;;  %v760_v14 = vmul.f32 %v1151_v6, %v1351_v30 }
 0x1e8   : > { %1162 = vtanh.f32 %v725_v7  ;;  %v759_v12 = vmul.f32 %v1153_v10, %v1351_v30 }
 0x1e9   : > { %1164 = vtanh.f32 %v720_v11  ;;  %v795_v20 = vsel %vm767_vm2, %v760_v14, 0.0 }
 0x1ea   : > { %v1155_v15 = vpop.eup %1154  ;;  %790 = vadd.xlane.f32.xlu1 %v789_v13  ;;  %v792_v16 = vsel %vm767_vm2, %v759_v12, 0.0 }
 0x1eb   : > { %v1157_v18 = vpop.eup %1156  ;;  %793 = vadd.xlane.f32.xlu0 %v792_v16  ;;  %v762_v17 = vmul.f32 %v1155_v15, %v1351_v30 }
 0x1ec   : > { %v761_v19 = vmul.f32 %v1157_v18, %v1351_v30 }
 0x1ed   : > { %v801_v25 = vsel %vm767_vm2, %v762_v17, 0.0 }
 0x1ee   : > { %v1159_v21 = vpop.eup %1158  ;;  %796 = vadd.xlane.f32.xlu1 %v795_v20  ;;  %v798_v22 = vsel %vm767_vm2, %v761_v19, 0.0 }
 0x1ef   : > { %v1161_v23 = vpop.eup %1160  ;;  %799 = vadd.xlane.f32.xlu0 %v798_v22  ;;  %v764_v26 = vmul.f32 %v1159_v21, %v1351_v30 }
 0x1f0   : > { %v763_v24 = vmul.f32 %v1161_v23, %v1351_v30 }
 0x1f1   : > { %v807_v32 = vsel %vm767_vm2, %v764_v26, 0.0 }
 0x1f2   : > { %v1163_v27 = vpop.eup %1162  ;;  %802 = vadd.xlane.f32.xlu1 %v801_v25  ;;  %v804_v28 = vsel %vm767_vm2, %v763_v24, 0.0 }
 0x1f3   : > { %v1165_v29 = vpop.eup %1164  ;;  %805 = vadd.xlane.f32.xlu0 %v804_v28  ;;  %v766_v33 = vmul.f32 %v1163_v27, %v1351_v30 }
 0x1f4   : > { %v765_v31 = vmul.f32 %v1165_v29, %v1351_v30 }
 0x1f5   : > { %v813_v35 = vsel %vm767_vm2, %v766_v33, 0.0 }
 0x1f6   : > { %808 = vadd.xlane.f32.xlu1 %v807_v32  ;;  %v810_v34 = vsel %vm767_vm2, %v765_v31, 0.0 }
 0x1f7   : > { %811 = vadd.xlane.f32.xlu0 %v810_v34 }
 0x1fa   : > { %814 = vadd.xlane.f32.xlu1 %v813_v35 }
 0x267   : > { %v773_v30 = vpop.xlane.xlu0 %772 }
 0x268   : > { %v819_v37 = vadd.f32 %v817_v36, %v773_v30 }
 0x26a   : > { %836 = vst.msk [vmem:[%s1400_s18 + $0x8] sm:$0xff] %vm834_vm3, %v819_v37 }
 0x26b   : > { %v779_v38 = vpop.xlane.xlu1 %778  ;;  %v770_v39 = vpop.xlane.xlu0 %769 }
 0x26c   : > { %v821_v40 = vadd.f32 %v817_v36, %v779_v38  ;;  %v818_v41 = vadd.f32 %v817_v36, %v770_v39 }
 0x26e   : > { %838 = vst.msk [vmem:[%s1400_s18 + $0x18] sm:$0xff] %vm834_vm3, %v821_v40  ;;  %835 = vst.msk [vmem:[%s1400_s18] sm:$0xff] %vm834_vm3, %v818_v41 }
 0x26f   : > { %v776_v42 = vpop.xlane.xlu1 %775 }
 0x270   : > { %v820_v43 = vadd.f32 %v817_v36, %v776_v42  ;;  %v782_v44 = vpop.xlane.xlu0 %781 }
 0x271   : > { %v822_v45 = vadd.f32 %v817_v36, %v782_v44 }
 0x272   : > { %837 = vst.msk [vmem:[%s1400_s18 + $0x10] sm:$0xff] %vm834_vm3, %v820_v43 }
 0x273   : > { %839 = vst.msk [vmem:[%s1400_s18 + $0x20] sm:$0xff] %vm834_vm3, %v822_v45  ;;  %v785_v46 = vpop.xlane.xlu1 %784 }
 0x274   : > { %v823_v47 = vadd.f32 %v817_v36, %v785_v46  ;;  %v788_v48 = vpop.xlane.xlu0 %787 }
 0x275   : > { %v824_v49 = vadd.f32 %v817_v36, %v788_v48 }
 0x276   : > { %840 = vst.msk [vmem:[%s1400_s18 + $0x28] sm:$0xff] %vm834_vm3, %v823_v47 }
 0x277   : > { %841 = vst.msk [vmem:[%s1400_s18 + $0x30] sm:$0xff] %vm834_vm3, %v824_v49  ;;  %v791_v50 = vpop.xlane.xlu1 %790 }
 0x278   : > { %v825_v51 = vadd.f32 %v817_v36, %v791_v50  ;;  %v794_v52 = vpop.xlane.xlu0 %793 }
 0x279   : > { %v826_v53 = vadd.f32 %v817_v36, %v794_v52 }
 0x27a   : > { %842 = vst.msk [vmem:[%s1400_s18 + $0x38] sm:$0xff] %vm834_vm3, %v825_v51 }
 0x27b   : > { %843 = vst.msk [vmem:[%s1400_s18 + $0x40] sm:$0xff] %vm834_vm3, %v826_v53  ;;  %v797_v54 = vpop.xlane.xlu1 %796 }
 0x27c   : > { %v827_v55 = vadd.f32 %v817_v36, %v797_v54  ;;  %v800_v56 = vpop.xlane.xlu0 %799 }
 0x27d   : > { %v828_v57 = vadd.f32 %v817_v36, %v800_v56 }
 0x27e   : > { %844 = vst.msk [vmem:[%s1400_s18 + $0x48] sm:$0xff] %vm834_vm3, %v827_v55 }
 0x27f   : > { %845 = vst.msk [vmem:[%s1400_s18 + $0x50] sm:$0xff] %vm834_vm3, %v828_v57  ;;  %v803_v58 = vpop.xlane.xlu1 %802 }
 0x280   : > { %v829_v59 = vadd.f32 %v817_v36, %v803_v58  ;;  %v806_v60 = vpop.xlane.xlu0 %805 }
 0x281   : > { %v830_v61 = vadd.f32 %v817_v36, %v806_v60 }
 0x282   : > { %846 = vst.msk [vmem:[%s1400_s18 + $0x58] sm:$0xff] %vm834_vm3, %v829_v59 }
 0x283   : > { %847 = vst.msk [vmem:[%s1400_s18 + $0x60] sm:$0xff] %vm834_vm3, %v830_v61  ;;  %v809_v62 = vpop.xlane.xlu1 %808 }
 0x284   : > { %v831_v63 = vadd.f32 %v817_v36, %v809_v62  ;;  %v812_v0 = vpop.xlane.xlu0 %811 }
 0x285   : > { %v832_v1 = vadd.f32 %v817_v36, %v812_v0 }
 0x286   : > { %848 = vst.msk [vmem:[%s1400_s18 + $0x68] sm:$0xff] %vm834_vm3, %v831_v63 }
 0x287   : > { %849 = vst.msk [vmem:[%s1400_s18 + $0x70] sm:$0xff] %vm834_vm3, %v832_v1  ;;  %v815_v2 = vpop.xlane.xlu1 %814 }
 0x288   : > { %v833_v3 = vadd.f32 %v817_v36, %v815_v2 }
 0x28a   : > { %850 = vst.msk [vmem:[%s1400_s18 + $0x78] sm:$0xff] %vm834_vm3, %v833_v3 }
 0x28b PF: > { %s18_s26 = sadd.s32 1, %s1172_s26  }
 0x28c   : > { %p15_p4 = scmp.ge.s32.totalorder %s18_s26, 5  }
 0x28e   :  { %17 = sbr.rel (!%p15_p4) target bundleno = 2 (0x2), region = 78 }

</bundles_post_ra>
